<compile_context>
chip_gen: v6e
topology: v6e:2x2x1
jax: 0.10.0
libtpu: 0.0.40
codegen_flags: <defaults>
</compile_context>

<pallas_src>
import functools

import jax
import jax.numpy as jnp
from jax.experimental import pallas as pl
from jax.experimental.pallas import tpu as pltpu


LN_EPS = 1e-5          # PyTorch nn.LayerNorm default
NORM_EPS = 1e-12       # F.normalize default eps
POOL_EPS = 1e-9        # clamp min in mean_pooling
NEG_BIG = -1e30        # mask value for padded logit lanes (finite -> no 0*inf NaNs)


def _predictor_kernel(emb_ref, mask_ref, lbl_ref,
                      w1_ref, b1_ref, g1_ref, be1_ref,
                      w2_ref, b2_ref, w3_ref, b3_ref,
                      out_ref,
                      pooled_acc, msum_acc,
                      *, num_classes, normalize):
    s_idx = pl.program_id(1)
    num_s = pl.num_programs(1)

    # ---- accumulator init (first seq tile of this batch tile) ----
    @pl.when(s_idx == 0)
    def _():
        pooled_acc[...] = jnp.zeros_like(pooled_acc)
        msum_acc[...] = jnp.zeros_like(msum_acc)

    # ---- streamed mean-pooling accumulation (per-tile upcast, f32 accumulate) ----
    emb = emb_ref[...].astype(jnp.float32)            # (TB, TS, H)
    m = mask_ref[...].astype(jnp.float32)             # (TB, TS, 1)
    pooled_acc[...] += jnp.sum(emb * m, axis=1)       # (TB, H)
    msum_acc[...] += jnp.sum(m, axis=1)               # (TB, 1)

    # ---- finalize: pooling divide, normalize, MLPAdaptor, softmax, CE ----
    @pl.when(s_idx == num_s - 1)
    def _():
        inv_cnt = pl.reciprocal(jnp.maximum(msum_acc[...], POOL_EPS), approx=True)
        x = pooled_acc[...] * inv_cnt                  # (TB, H)  mean pooling

        if normalize:                                  # F.normalize(x, p=2, dim=1)
            l2 = jnp.sqrt(jnp.sum(x * x, axis=-1, keepdims=True))
            x = x / jnp.maximum(l2, NORM_EPS)

        # MLPAdaptor: Linear -> ReLU -> LayerNorm -> (Dropout eval noop) -> Linear -> ReLU -> Linear
        h = jnp.dot(x, w1_ref[...], preferred_element_type=jnp.float32) + b1_ref[...]
        h = jnp.maximum(h, 0.0)
        mu = jnp.mean(h, axis=-1, keepdims=True)
        var = jnp.mean((h - mu) ** 2, axis=-1, keepdims=True)
        h = (h - mu) * jax.lax.rsqrt(var + LN_EPS) * g1_ref[...] + be1_ref[...]
        h = jnp.dot(h, w2_ref[...], preferred_element_type=jnp.float32) + b2_ref[...]
        h = jnp.maximum(h, 0.0)
        z = jnp.dot(h, w3_ref[...], preferred_element_type=jnp.float32) + b3_ref[...]  # (TB, CPAD)

        tb, cpad = z.shape
        col = jax.lax.broadcasted_iota(jnp.int32, (tb, cpad), 1)
        valid = col < num_classes
        z = jnp.where(valid, z, NEG_BIG)               # mask padded lanes

        # softmax over the C real classes
        zmax = jnp.max(z, axis=-1, keepdims=True)
        e = jnp.exp(z - zmax)
        ssum = jnp.sum(e, axis=-1, keepdims=True)
        probs = e * pl.reciprocal(ssum, approx=True)   # padded lanes -> 0

        # cross-entropy (per-row NLL; exact log for the loss path)
        logp = (z - zmax) - jnp.log(ssum)
        onehot = (col == lbl_ref[...]).astype(jnp.float32)   # labels in [0, C)
        nll = -jnp.sum(onehot * logp, axis=-1, keepdims=True)  # (TB, 1)

        # packed lane-dense output slab: cols [0,C) = softmax logits, col C = NLL
        out_ref[...] = jnp.where(col == num_classes, nll, probs)


def _largest_tile(total, limit, quantum):
    """Largest t dividing `total` with t <= limit and t % quantum == 0 (or t == total)."""
    if total <= limit:
        return total
    t = (limit // quantum) * quantum
    while t >= quantum:
        if total % t == 0:
            return t
        t -= quantum
    return total


def output_length_predictor_forward(token_emb, attention_mask, labels, params,
                                    normalize_embeddings=True, tb=None, ts=None):
    """token_emb: (B,S,H) in its native dtype (e.g. bf16) — base_model output [0];
       attention_mask: (B,S) int/float; labels: (B,) int. Returns {'loss', 'logits'}."""
    B, S, H = token_emb.shape
    D1 = params["w1"].shape[1]
    D2 = params["w2"].shape[1]
    C = params["w3"].shape[1]
    CPAD = ((C + 1 + 127) // 128) * 128                # lane-dense output width (logits + nll col)
    assert C + 1 <= CPAD

    # tile selection: big batch tile to feed the MXU, seq tile sized for the VMEM stream
    if tb is None:
        tb = _largest_tile(B, 256, 8)
    if ts is None:
        itemsize = jnp.dtype(token_emb.dtype).itemsize
        budget = 8 * 1024 * 1024                       # double-buffered emb stream budget
        ts_cap = max(8, min(512, budget // max(1, 2 * tb * H * itemsize)))
        ts = _largest_tile(S, ts_cap, 8)
    assert B % tb == 0 and S % ts == 0

    # pad final projection to a lane-dense width; padded lanes masked in-kernel
    w3p = jnp.zeros((D2, CPAD), jnp.float32).at[:, :C].set(params["w3"])
    b3p = jnp.zeros((1, CPAD), jnp.float32).at[:, :C].set(params["b3"])

    mask3 = attention_mask.reshape(B, S, 1)            # keep native int dtype; cast per-tile
    lbl2 = labels.astype(jnp.int32).reshape(B, 1)

    grid = (B // tb, S // ts)
    const2 = lambda b, s: (0, 0)

    kernel = pl.pallas_call(
        functools.partial(_predictor_kernel, num_classes=C,
                          normalize=normalize_embeddings),
        out_shape=jax.ShapeDtypeStruct((B, CPAD), jnp.float32),
        grid_spec=pltpu.PrefetchScalarGridSpec(
            num_scalar_prefetch=0,
            grid=grid,
            in_specs=[
                pl.BlockSpec((tb, ts, H), lambda b, s: (b, s, 0)),  # streamed embeddings (native dtype)
                pl.BlockSpec((tb, ts, 1), lambda b, s: (b, s, 0)),  # streamed attention mask
                pl.BlockSpec((tb, 1), lambda b, s: (b, 0)),         # integer labels
                pl.BlockSpec((H, D1), const2),                      # weights: constant index_map
                pl.BlockSpec((1, D1), const2),                      #  -> DMA'd once, VMEM-resident
                pl.BlockSpec((1, D1), const2),
                pl.BlockSpec((1, D1), const2),
                pl.BlockSpec((D1, D2), const2),
                pl.BlockSpec((1, D2), const2),
                pl.BlockSpec((D2, CPAD), const2),
                pl.BlockSpec((1, CPAD), const2),
            ],
            out_specs=pl.BlockSpec((tb, CPAD), lambda b, s: (b, 0)),
            scratch_shapes=[
                pltpu.VMEM((tb, H), jnp.float32),   # pooled-sum accumulator
                pltpu.VMEM((tb, 1), jnp.float32),   # mask-count accumulator
            ],
        ),
        compiler_params=pltpu.CompilerParams(
            dimension_semantics=("parallel", "arbitrary")),
    )
    slab = kernel(token_emb, mask3, lbl2,
                  params["w1"], params["b1"], params["g1"], params["be1"],
                  params["w2"], params["b2"], w3p, b3p)

    logits = slab[:, :C]
    loss = jnp.mean(slab[:, C])                        # mean over GLOBAL batch
    return {"loss": loss, "logits": logits}


def init_params(key, H, D1, D2, C):
    ks = jax.random.split(key, 6)
    scale = 0.05
    return {
        "w1": scale * jax.random.normal(ks[0], (H, D1), jnp.float32),
        "b1": jnp.zeros((1, D1), jnp.float32),
        "g1": jnp.ones((1, D1), jnp.float32),    # LayerNorm weight
        "be1": jnp.zeros((1, D1), jnp.float32),  # LayerNorm bias
        "w2": scale * jax.random.normal(ks[1], (D1, D2), jnp.float32),
        "b2": scale * jax.random.normal(ks[2], (1, D2), jnp.float32),
        "w3": scale * jax.random.normal(ks[3], (D2, C), jnp.float32),
        "b3": scale * jax.random.normal(ks[4], (1, C), jnp.float32),
    }


def _reference(token_emb, attention_mask, labels, params, normalize):
    """Pure-JAX reference of the PyTorch forward (f32)."""
    emb = token_emb.astype(jnp.float32)
    m = attention_mask.astype(jnp.float32)[:, :, None]
    x = jnp.sum(emb * m, axis=1) / jnp.maximum(jnp.sum(m, axis=1), POOL_EPS)
    if normalize:
        x = x / jnp.maximum(jnp.linalg.norm(x, axis=1, keepdims=True), NORM_EPS)
    h = jnp.maximum(x @ params["w1"] + params["b1"], 0.0)
    mu = jnp.mean(h, axis=-1, keepdims=True)
    var = jnp.mean((h - mu) ** 2, axis=-1, keepdims=True)
    h = (h - mu) / jnp.sqrt(var + LN_EPS) * params["g1"] + params["be1"]
    h = jnp.maximum(h @ params["w2"] + params["b2"], 0.0)
    z = h @ params["w3"] + params["b3"]
    logits = jax.nn.softmax(z, axis=1)
    logp = jax.nn.log_softmax(z, axis=1)
    nll = -jnp.take_along_axis(logp, labels[:, None].astype(jnp.int32), axis=1)[:, 0]
    return jnp.mean(nll), logits


if __name__ == "__main__":
    key = jax.random.PRNGKey(0)
    B, S, H = 16, 64, 32          # batch, seq, base-model hidden size
    D1, D2, C = 64, 32, 8         # adaptor_hidden_dims=[64, 32], adaptor_output_dim=8
    VOCAB = 50

    k_ids, k_len, k_emb, k_lbl, k_par = jax.random.split(key, 5)

    # --- stubbed base_model: deterministic bf16 embedding lookup (plain-JAX glue) ---
    input_ids = jax.random.randint(k_ids, (B, S), 0, VOCAB)
    emb_table = (0.1 * jax.random.normal(k_emb, (VOCAB, H), jnp.float32)).astype(jnp.bfloat16)
    token_emb = emb_table[input_ids]                    # (B, S, H) bf16 ~ base_model(...)[0]

    # attention mask: per-row valid lengths in [S//2, S]
    lengths = jax.random.randint(k_len, (B,), S // 2, S + 1)
    attention_mask = (jnp.arange(S)[None, :] < lengths[:, None]).astype(jnp.int32)

    labels = jax.random.randint(k_lbl, (B,), 0, C).astype(jnp.int32)
    params = init_params(k_par, H, D1, D2, C)

    # tb=8, ts=16 -> grid (2, 4): exercises the parallel batch axis and the streamed seq axis
    out = output_length_predictor_forward(token_emb, attention_mask, labels, params,
                                          normalize_embeddings=True, tb=8, ts=16)
    jax.block_until_ready(out)

    assert out["logits"].shape == (B, C)
    assert out["loss"].shape == ()
    assert bool(jnp.all(jnp.isfinite(out["logits"])))
    assert bool(jnp.isfinite(out["loss"]))
    # softmax rows sum to 1 (approx reciprocal on the denominator -> loose tolerance)
    assert bool(jnp.allclose(jnp.sum(out["logits"], axis=1), 1.0, atol=1e-2))

    # cross-check against the pure-JAX reference (generous tolerances: bf16 stream,
    # approx reciprocal, default MXU precision)
    ref_loss, ref_logits = _reference(token_emb, attention_mask, labels, params, True)
    assert float(jnp.max(jnp.abs(out["logits"] - ref_logits))) < 3e-2
    assert float(jnp.abs(out["loss"] - ref_loss)) < 3e-2

    print("KERNEL_OK")
</pallas_src>

<mosaic_0001>
module attributes {stable_mosaic.version = 11 : i64} {
  func.func @_predictor_kernel(%arg0: i32, %arg1: i32, %arg2: memref<8x16x32xbf16, #tpu.memory_space<vmem>>, %arg3: memref<8x16x1xi32, #tpu.memory_space<vmem>>, %arg4: memref<8x1xi32, #tpu.memory_space<vmem>>, %arg5: memref<32x64xf32, #tpu.memory_space<vmem>>, %arg6: memref<1x64xf32, #tpu.memory_space<vmem>>, %arg7: memref<1x64xf32, #tpu.memory_space<vmem>>, %arg8: memref<1x64xf32, #tpu.memory_space<vmem>>, %arg9: memref<64x32xf32, #tpu.memory_space<vmem>>, %arg10: memref<1x32xf32, #tpu.memory_space<vmem>>, %arg11: memref<32x128xf32, #tpu.memory_space<vmem>>, %arg12: memref<1x128xf32, #tpu.memory_space<vmem>>, %arg13: memref<8x128xf32, #tpu.memory_space<vmem>>, %arg14: memref<8x32xf32, #tpu.memory_space<vmem>>, %arg15: memref<8x1xf32, #tpu.memory_space<vmem>>) attributes {dimension_semantics = [#tpu.dimension_semantics<parallel>, #tpu.dimension_semantics<arbitrary>], iteration_bounds = array<i64: 2, 4>, scalar_prefetch = 0 : i64, scratch_operands = 2 : i64, tpu.core_type = #tpu.core_type<tc>, window_params = [{transform_indices = @transform_0, window_bounds = array<i64: 8, 16, 32>}, {transform_indices = @transform_1, window_bounds = array<i64: 8, 16, 1>}, {transform_indices = @transform_2, window_bounds = array<i64: 8, 1>}, {pipeline_mode = #tpu.pipeline_mode<synchronous>, transform_indices = @transform_3, window_bounds = array<i64: 32, 64>}, {pipeline_mode = #tpu.pipeline_mode<synchronous>, transform_indices = @transform_4, window_bounds = array<i64: 1, 64>}, {pipeline_mode = #tpu.pipeline_mode<synchronous>, transform_indices = @transform_5, window_bounds = array<i64: 1, 64>}, {pipeline_mode = #tpu.pipeline_mode<synchronous>, transform_indices = @transform_6, window_bounds = array<i64: 1, 64>}, {pipeline_mode = #tpu.pipeline_mode<synchronous>, transform_indices = @transform_7, window_bounds = array<i64: 64, 32>}, {pipeline_mode = #tpu.pipeline_mode<synchronous>, transform_indices = @transform_8, window_bounds = array<i64: 1, 32>}, {pipeline_mode = #tpu.pipeline_mode<synchronous>, transform_indices = @transform_9, window_bounds = array<i64: 32, 128>}, {pipeline_mode = #tpu.pipeline_mode<synchronous>, transform_indices = @transform_10, window_bounds = array<i64: 1, 128>}, {transform_indices = @transform_11, window_bounds = array<i64: 8, 128>}]} {
    %c0_i32 = arith.constant 0 : i32
    %0 = arith.cmpi eq, %arg1, %c0_i32 : i32
    %1 = arith.extui %0 : i1 to i32
    %c0_i32_0 = arith.constant 0 : i32
    %2 = arith.cmpi ne, %1, %c0_i32_0 : i32
    scf.if %2 {
      %cst_16 = arith.constant 0.000000e+00 : f32
      %20 = vector.broadcast %cst_16 : f32 to vector<8x32xf32>
      %c0_17 = arith.constant 0 : index
      %c0_18 = arith.constant 0 : index
      %21 = vector.load %arg14[%c0_17, %c0_18] : memref<8x32xf32, #tpu.memory_space<vmem>>, vector<8x32xf32>
      tpu.vector_store %arg14[%c0_17, %c0_18], %20 {strides = array<i32>} : memref<8x32xf32, #tpu.memory_space<vmem>>, vector<8x32xf32>,
      %cst_19 = arith.constant 0.000000e+00 : f32
      %22 = vector.broadcast %cst_19 : f32 to vector<8x1xf32>
      %c0_20 = arith.constant 0 : index
      %c0_21 = arith.constant 0 : index
      %23 = vector.load %arg15[%c0_20, %c0_21] : memref<8x1xf32, #tpu.memory_space<vmem>>, vector<8x1xf32>
      tpu.vector_store %arg15[%c0_20, %c0_21], %22 {strides = array<i32>} : memref<8x1xf32, #tpu.memory_space<vmem>>, vector<8x1xf32>,
    } else {
    }
    %c0 = arith.constant 0 : index
    %c0_1 = arith.constant 0 : index
    %c0_2 = arith.constant 0 : index
    %3 = vector.load %arg2[%c0, %c0_1, %c0_2] : memref<8x16x32xbf16, #tpu.memory_space<vmem>>, vector<8x16x32xbf16>
    %4 = arith.extf %3 : vector<8x16x32xbf16> to vector<8x16x32xf32>
    %c0_3 = arith.constant 0 : index
    %c0_4 = arith.constant 0 : index
    %c0_5 = arith.constant 0 : index
    %5 = vector.load %arg3[%c0_3, %c0_4, %c0_5] : memref<8x16x1xi32, #tpu.memory_space<vmem>>, vector<8x16x1xi32>
    %6 = arith.sitofp %5 : vector<8x16x1xi32> to vector<8x16x1xf32>
    %c0_6 = arith.constant 0 : index
    %c0_7 = arith.constant 0 : index
    %7 = vector.load %arg14[%c0_6, %c0_7] : memref<8x32xf32, #tpu.memory_space<vmem>>, vector<8x32xf32>
    %8 = vector.broadcast %6 : vector<8x16x1xf32> to vector<8x16x32xf32>
    %9 = arith.mulf %4, %8 : vector<8x16x32xf32>
    %cst = arith.constant dense<0.000000e+00> : vector<8x32xf32>
    %10 = vector.multi_reduction <add>, %9, %cst [1] : vector<8x16x32xf32> to vector<8x32xf32>
    %11 = arith.addf %7, %10 : vector<8x32xf32>
    %c0_8 = arith.constant 0 : index
    %c0_9 = arith.constant 0 : index
    %12 = vector.load %arg14[%c0_8, %c0_9] : memref<8x32xf32, #tpu.memory_space<vmem>>, vector<8x32xf32>
    tpu.vector_store %arg14[%c0_8, %c0_9], %11 {strides = array<i32>} : memref<8x32xf32, #tpu.memory_space<vmem>>, vector<8x32xf32>,
    %c0_10 = arith.constant 0 : index
    %c0_11 = arith.constant 0 : index
    %13 = vector.load %arg15[%c0_10, %c0_11] : memref<8x1xf32, #tpu.memory_space<vmem>>, vector<8x1xf32>
    %cst_12 = arith.constant dense<0.000000e+00> : vector<8x1xf32>
    %14 = vector.multi_reduction <add>, %6, %cst_12 [1] : vector<8x16x1xf32> to vector<8x1xf32>
    %15 = arith.addf %13, %14 : vector<8x1xf32>
    %c0_13 = arith.constant 0 : index
    %c0_14 = arith.constant 0 : index
    %16 = vector.load %arg15[%c0_13, %c0_14] : memref<8x1xf32, #tpu.memory_space<vmem>>, vector<8x1xf32>
    tpu.vector_store %arg15[%c0_13, %c0_14], %15 {strides = array<i32>} : memref<8x1xf32, #tpu.memory_space<vmem>>, vector<8x1xf32>,
    %c3_i32 = arith.constant 3 : i32
    %17 = arith.cmpi eq, %arg1, %c3_i32 : i32
    %18 = arith.extui %17 : i1 to i32
    %c0_i32_15 = arith.constant 0 : i32
    %19 = arith.cmpi ne, %18, %c0_i32_15 : i32
    scf.if %19 {
      %c0_16 = arith.constant 0 : index
      %c0_17 = arith.constant 0 : index
      %20 = vector.load %arg15[%c0_16, %c0_17] : memref<8x1xf32, #tpu.memory_space<vmem>>, vector<8x1xf32>
      %cst_18 = arith.constant 9.99999971E-10 : f32
      %21 = vector.broadcast %cst_18 : f32 to vector<8x1xf32>
      %22 = arith.maximumf %20, %21 : vector<8x1xf32>
      %23 = tpu.reciprocal %22 {approx = true} : vector<8x1xf32> -> vector<8x1xf32>
      %c0_19 = arith.constant 0 : index
      %c0_20 = arith.constant 0 : index
      %24 = vector.load %arg14[%c0_19, %c0_20] : memref<8x32xf32, #tpu.memory_space<vmem>>, vector<8x32xf32>
      %25 = vector.broadcast %23 : vector<8x1xf32> to vector<8x32xf32>
      %26 = arith.mulf %24, %25 : vector<8x32xf32>
      %27 = arith.mulf %26, %26 : vector<8x32xf32>
      %cst_21 = arith.constant dense<0.000000e+00> : vector<8xf32>
      %28 = vector.multi_reduction <add>, %27, %cst_21 [1] : vector<8x32xf32> to vector<8xf32>
      %29 = vector.shape_cast %28 : vector<8xf32> to vector<8x1xf32>
      %30 = math.sqrt %29 : vector<8x1xf32>
      %cst_22 = arith.constant 9.99999996E-13 : f32
      %31 = vector.broadcast %cst_22 : f32 to vector<8x1xf32>
      %32 = arith.maximumf %30, %31 : vector<8x1xf32>
      %33 = vector.broadcast %32 : vector<8x1xf32> to vector<8x32xf32>
      %34 = arith.divf %26, %33 : vector<8x32xf32>
      %c0_23 = arith.constant 0 : index
      %c0_24 = arith.constant 0 : index
      %35 = vector.load %arg5[%c0_23, %c0_24] : memref<32x64xf32, #tpu.memory_space<vmem>>, vector<32x64xf32>
      %cst_25 = arith.constant dense<0.000000e+00> : vector<8x64xf32>
      %36 = tpu.matmul %34, %35, %cst_25 {dimension_numbers = #tpu.dot_dimension_numbers<[1], [0], [0], [1], [0, 0, 1, 1], [], []>} : vector<8x32xf32>, vector<32x64xf32>, vector<8x64xf32> -> vector<8x64xf32>
      %c0_26 = arith.constant 0 : index
      %c0_27 = arith.constant 0 : index
      %37 = vector.load %arg6[%c0_26, %c0_27] : memref<1x64xf32, #tpu.memory_space<vmem>>, vector<1x64xf32>
      %38 = vector.broadcast %37 : vector<1x64xf32> to vector<8x64xf32>
      %39 = arith.addf %36, %38 : vector<8x64xf32>
      %cst_28 = arith.constant 0.000000e+00 : f32
      %40 = vector.broadcast %cst_28 : f32 to vector<8x64xf32>
      %41 = arith.maximumf %39, %40 : vector<8x64xf32>
      %cst_29 = arith.constant dense<0.000000e+00> : vector<8xf32>
      %42 = vector.multi_reduction <add>, %41, %cst_29 [1] : vector<8x64xf32> to vector<8xf32>
      %43 = vector.shape_cast %42 : vector<8xf32> to vector<8x1xf32>
      %cst_30 = arith.constant 6.400000e+01 : f32
      %44 = vector.broadcast %cst_30 : f32 to vector<8x1xf32>
      %45 = arith.divf %43, %44 : vector<8x1xf32>
      %46 = vector.broadcast %45 : vector<8x1xf32> to vector<8x64xf32>
      %47 = arith.subf %41, %46 : vector<8x64xf32>
      %48 = arith.mulf %47, %47 : vector<8x64xf32>
      %cst_31 = arith.constant dense<0.000000e+00> : vector<8xf32>
      %49 = vector.multi_reduction <add>, %48, %cst_31 [1] : vector<8x64xf32> to vector<8xf32>
      %50 = vector.shape_cast %49 : vector<8xf32> to vector<8x1xf32>
      %cst_32 = arith.constant 6.400000e+01 : f32
      %51 = vector.broadcast %cst_32 : f32 to vector<8x1xf32>
      %52 = arith.divf %50, %51 : vector<8x1xf32>
      %53 = vector.broadcast %45 : vector<8x1xf32> to vector<8x64xf32>
      %54 = arith.subf %41, %53 : vector<8x64xf32>
      %cst_33 = arith.constant 9.99999974E-6 : f32
      %55 = vector.broadcast %cst_33 : f32 to vector<8x1xf32>
      %56 = arith.addf %52, %55 : vector<8x1xf32>
      %57 = math.rsqrt %56 : vector<8x1xf32>
      %58 = vector.broadcast %57 : vector<8x1xf32> to vector<8x64xf32>
      %59 = arith.mulf %54, %58 : vector<8x64xf32>
      %c0_34 = arith.constant 0 : index
      %c0_35 = arith.constant 0 : index
      %60 = vector.load %arg7[%c0_34, %c0_35] : memref<1x64xf32, #tpu.memory_space<vmem>>, vector<1x64xf32>
      %61 = vector.broadcast %60 : vector<1x64xf32> to vector<8x64xf32>
      %62 = arith.mulf %59, %61 : vector<8x64xf32>
      %c0_36 = arith.constant 0 : index
      %c0_37 = arith.constant 0 : index
      %63 = vector.load %arg8[%c0_36, %c0_37] : memref<1x64xf32, #tpu.memory_space<vmem>>, vector<1x64xf32>
      %64 = vector.broadcast %63 : vector<1x64xf32> to vector<8x64xf32>
      %65 = arith.addf %62, %64 : vector<8x64xf32>
      %c0_38 = arith.constant 0 : index
      %c0_39 = arith.constant 0 : index
      %66 = vector.load %arg9[%c0_38, %c0_39] : memref<64x32xf32, #tpu.memory_space<vmem>>, vector<64x32xf32>
      %cst_40 = arith.constant dense<0.000000e+00> : vector<8x32xf32>
      %67 = tpu.matmul %65, %66, %cst_40 {dimension_numbers = #tpu.dot_dimension_numbers<[1], [0], [0], [1], [0, 0, 1, 1], [], []>} : vector<8x64xf32>, vector<64x32xf32>, vector<8x32xf32> -> vector<8x32xf32>
      %c0_41 = arith.constant 0 : index
      %c0_42 = arith.constant 0 : index
      %68 = vector.load %arg10[%c0_41, %c0_42] : memref<1x32xf32, #tpu.memory_space<vmem>>, vector<1x32xf32>
      %69 = vector.broadcast %68 : vector<1x32xf32> to vector<8x32xf32>
      %70 = arith.addf %67, %69 : vector<8x32xf32>
      %cst_43 = arith.constant 0.000000e+00 : f32
      %71 = vector.broadcast %cst_43 : f32 to vector<8x32xf32>
      %72 = arith.maximumf %70, %71 : vector<8x32xf32>
      %c0_44 = arith.constant 0 : index
      %c0_45 = arith.constant 0 : index
      %73 = vector.load %arg11[%c0_44, %c0_45] : memref<32x128xf32, #tpu.memory_space<vmem>>, vector<32x128xf32>
      %cst_46 = arith.constant dense<0.000000e+00> : vector<8x128xf32>
      %74 = tpu.matmul %72, %73, %cst_46 {dimension_numbers = #tpu.dot_dimension_numbers<[1], [0], [0], [1], [0, 0, 1, 1], [], []>} : vector<8x32xf32>, vector<32x128xf32>, vector<8x128xf32> -> vector<8x128xf32>
      %c0_47 = arith.constant 0 : index
      %c0_48 = arith.constant 0 : index
      %75 = vector.load %arg12[%c0_47, %c0_48] : memref<1x128xf32, #tpu.memory_space<vmem>>, vector<1x128xf32>
      %76 = vector.broadcast %75 : vector<1x128xf32> to vector<8x128xf32>
      %77 = arith.addf %74, %76 : vector<8x128xf32>
      %78 = tpu.iota {dimensions = array<i32: 1>} : vector<8x128xi32>
      %c8_i32 = arith.constant 8 : i32
      %79 = vector.broadcast %c8_i32 : i32 to vector<8x128xi32>
      %80 = arith.cmpi slt, %78, %79 : vector<8x128xi32>
      %cst_49 = arith.constant -1.000000e+30 : f32
      %81 = vector.broadcast %cst_49 : f32 to vector<8x128xf32>
      %82 = arith.select %80, %77, %81 : vector<8x128xi1>, vector<8x128xf32>
      %cst_50 = arith.constant dense<0xFF800000> : vector<8xf32>
      %83 = vector.multi_reduction <maximumf>, %82, %cst_50 [1] : vector<8x128xf32> to vector<8xf32>
      %84 = vector.shape_cast %83 : vector<8xf32> to vector<8x1xf32>
      %85 = vector.broadcast %84 : vector<8x1xf32> to vector<8x128xf32>
      %86 = arith.subf %82, %85 : vector<8x128xf32>
      %87 = math.exp %86 : vector<8x128xf32>
      %cst_51 = arith.constant dense<0.000000e+00> : vector<8xf32>
      %88 = vector.multi_reduction <add>, %87, %cst_51 [1] : vector<8x128xf32> to vector<8xf32>
      %89 = vector.shape_cast %88 : vector<8xf32> to vector<8x1xf32>
      %90 = tpu.reciprocal %89 {approx = true} : vector<8x1xf32> -> vector<8x1xf32>
      %91 = vector.broadcast %90 : vector<8x1xf32> to vector<8x128xf32>
      %92 = arith.mulf %87, %91 : vector<8x128xf32>
      %93 = vector.broadcast %84 : vector<8x1xf32> to vector<8x128xf32>
      %94 = arith.subf %82, %93 : vector<8x128xf32>
      %95 = math.log %89 : vector<8x1xf32>
      %96 = vector.broadcast %95 : vector<8x1xf32> to vector<8x128xf32>
      %97 = arith.subf %94, %96 : vector<8x128xf32>
      %c0_52 = arith.constant 0 : index
      %c0_53 = arith.constant 0 : index
      %98 = vector.load %arg4[%c0_52, %c0_53] : memref<8x1xi32, #tpu.memory_space<vmem>>, vector<8x1xi32>
      %99 = vector.broadcast %98 : vector<8x1xi32> to vector<8x128xi32>
      %100 = arith.cmpi eq, %78, %99 : vector<8x128xi32>
      %101 = arith.extui %100 : vector<8x128xi1> to vector<8x128xi32>
      %102 = arith.sitofp %101 : vector<8x128xi32> to vector<8x128xf32>
      %103 = arith.mulf %102, %97 : vector<8x128xf32>
      %cst_54 = arith.constant dense<0.000000e+00> : vector<8xf32>
      %104 = vector.multi_reduction <add>, %103, %cst_54 [1] : vector<8x128xf32> to vector<8xf32>
      %105 = vector.shape_cast %104 : vector<8xf32> to vector<8x1xf32>
      %cst_55 = arith.constant 0.000000e+00 : f32
      %106 = vector.broadcast %cst_55 : f32 to vector<8x1xf32>
      %107 = arith.subf %106, %105 : vector<8x1xf32>
      %c8_i32_56 = arith.constant 8 : i32
      %108 = vector.broadcast %c8_i32_56 : i32 to vector<8x128xi32>
      %109 = arith.cmpi eq, %78, %108 : vector<8x128xi32>
      %110 = vector.shape_cast %107 : vector<8x1xf32> to vector<8x1xf32>
      %111 = vector.broadcast %110 : vector<8x1xf32> to vector<8x128xf32>
      %112 = arith.select %109, %111, %92 : vector<8x128xi1>, vector<8x128xf32>
      %c0_57 = arith.constant 0 : index
      %c0_58 = arith.constant 0 : index
      %113 = vector.load %arg13[%c0_57, %c0_58] : memref<8x128xf32, #tpu.memory_space<vmem>>, vector<8x128xf32>
      tpu.vector_store %arg13[%c0_57, %c0_58], %112 {strides = array<i32>} : memref<8x128xf32, #tpu.memory_space<vmem>>, vector<8x128xf32>,
    } else {
    }
    return
  }
  func.func @transform_0(%arg0: i32, %arg1: i32) -> (i32, i32, i32) {
    %c0_i32 = arith.constant 0 : i32
    %c0_i32_0 = arith.constant 0 : i32
    return %arg0, %arg1, %c0_i32 : i32, i32, i32
  }
  func.func @transform_1(%arg0: i32, %arg1: i32) -> (i32, i32, i32) {
    %c0_i32 = arith.constant 0 : i32
    %c0_i32_0 = arith.constant 0 : i32
    return %arg0, %arg1, %c0_i32 : i32, i32, i32
  }
  func.func @transform_2(%arg0: i32, %arg1: i32) -> (i32, i32) {
    %c0_i32 = arith.constant 0 : i32
    %c0_i32_0 = arith.constant 0 : i32
    return %arg0, %c0_i32 : i32, i32
  }
  func.func @transform_3(%arg0: i32, %arg1: i32) -> (i32, i32) {
    %c0_i32 = arith.constant 0 : i32
    %c0_i32_0 = arith.constant 0 : i32
    %c0_i32_1 = arith.constant 0 : i32
    return %c0_i32, %c0_i32_0 : i32, i32
  }
  func.func @transform_4(%arg0: i32, %arg1: i32) -> (i32, i32) {
    %c0_i32 = arith.constant 0 : i32
    %c0_i32_0 = arith.constant 0 : i32
    %c0_i32_1 = arith.constant 0 : i32
    return %c0_i32, %c0_i32_0 : i32, i32
  }
  func.func @transform_5(%arg0: i32, %arg1: i32) -> (i32, i32) {
    %c0_i32 = arith.constant 0 : i32
    %c0_i32_0 = arith.constant 0 : i32
    %c0_i32_1 = arith.constant 0 : i32
    return %c0_i32, %c0_i32_0 : i32, i32
  }
  func.func @transform_6(%arg0: i32, %arg1: i32) -> (i32, i32) {
    %c0_i32 = arith.constant 0 : i32
    %c0_i32_0 = arith.constant 0 : i32
    %c0_i32_1 = arith.constant 0 : i32
    return %c0_i32, %c0_i32_0 : i32, i32
  }
  func.func @transform_7(%arg0: i32, %arg1: i32) -> (i32, i32) {
    %c0_i32 = arith.constant 0 : i32
    %c0_i32_0 = arith.constant 0 : i32
    %c0_i32_1 = arith.constant 0 : i32
    return %c0_i32, %c0_i32_0 : i32, i32
  }
  func.func @transform_8(%arg0: i32, %arg1: i32) -> (i32, i32) {
    %c0_i32 = arith.constant 0 : i32
    %c0_i32_0 = arith.constant 0 : i32
    %c0_i32_1 = arith.constant 0 : i32
    return %c0_i32, %c0_i32_0 : i32, i32
  }
  func.func @transform_9(%arg0: i32, %arg1: i32) -> (i32, i32) {
    %c0_i32 = arith.constant 0 : i32
    %c0_i32_0 = arith.constant 0 : i32
    %c0_i32_1 = arith.constant 0 : i32
    return %c0_i32, %c0_i32_0 : i32, i32
  }
  func.func @transform_10(%arg0: i32, %arg1: i32) -> (i32, i32) {
    %c0_i32 = arith.constant 0 : i32
    %c0_i32_0 = arith.constant 0 : i32
    %c0_i32_1 = arith.constant 0 : i32
    return %c0_i32, %c0_i32_0 : i32, i32
  }
  func.func @transform_11(%arg0: i32, %arg1: i32) -> (i32, i32) {
    %c0_i32 = arith.constant 0 : i32
    %c0_i32_0 = arith.constant 0 : i32
    return %arg0, %c0_i32 : i32, i32
  }
}

</mosaic_0001>

<bundles_post_ra>
// kernel: tpu_custom_call.1
= control target key start
LH: loop header
LB: loop body
LE: loop exit
PB: predicated region body
PF: predicated region fallthrough
CT: control target
= control target key end

     0   :  { %s2281_s0 = inlined_call_operand.vmem [shape: bf16[16,64,32], index: 0, kind: input, shape index: {}]   ;;  %s2282_s1 = inlined_call_operand.vmem [shape: s32[16,64,1], index: 1, kind: input, shape index: {}]   ;;  %s2283_s2 = inlined_call_operand.vmem [shape: s32[16,1], index: 2, kind: input, shape index: {}]   ;;  %s2284_s3 = inlined_call_operand.vmem [shape: f32[32,64], index: 3, kind: input, shape index: {}]   ;;  %s2285_s4 = inlined_call_operand.vmem [shape: f32[1,64], index: 4, kind: input, shape index: {}]   ;;  %s2286_s5 = inlined_call_operand.vmem [shape: f32[1,64], index: 5, kind: input, shape index: {}]   ;;  %s2287_s6 = inlined_call_operand.vmem [shape: f32[1,64], index: 6, kind: input, shape index: {}]   ;;  %s2288_s7 = inlined_call_operand.vmem [shape: f32[64,32], index: 7, kind: input, shape index: {}]   ;;  %s2289_s8 = inlined_call_operand.vmem [shape: f32[1,32], index: 8, kind: input, shape index: {}]   ;;  %s2290_s9 = inlined_call_operand.vmem [shape: f32[32,128], index: 9, kind: input, shape index: {}]   ;;  %s2291_s10 = inlined_call_operand.vmem [shape: f32[1,128], index: 10, kind: input, shape index: {}]   ;;  %s2292_s11 = inlined_call_operand.hbm [shape: f32[16,128], index: 11, kind: output, shape index: {}]  }
   0x1   :  { %2298 = sst [smem:[#allocation14_spill]] %s2281_s0 }
   0x2   :  { %2299 = sst [smem:[#allocation15_spill]] %s2289_s8 }
   0x3   :  { %2300 = sst [smem:[#allocation16_spill]] %s2291_s10 }
   0x4   :  { %2301 = sst [smem:[#allocation17_spill]] %s2292_s11 }
   0x5   :  { %16 = vsyncpa [#allocation7], 0 }
   0x6   :  { %18 = vsyncpa [#allocation7 + $0x1], 0  ;;  %s1901_s17 = smov 0   ;;  %s1903_s18 = smov 0  }
   0x7   :  { %s1905_s19 = smov 0   ;;  %s1907_s20 = smov 0  }
   0x8   :  { %s1909_s21 = smov 0   ;;  %s1911_s22 = smov 0  }
   0x9   :  { %s1913_s23 = smov 0   ;;  %s1915_s24 = smov 0  }
   0xa   :  { %s1917_s25 = smov 0   ;;  %s1919_s26 = smov 0  }
   0xb LB: > { %2302 = sst [smem:[#allocation9_spill]] %s1797_s17  ;;  %s1480_s27 = sadd.s32 4294967295, %s1833_s26   ;;  %s1833_s26 = sphi %s1919_s26, %s24_s26   ;;  %s1829_s25 = sphi %s1917_s25, %s2327_s25   ;;  %s1825_s24 = sphi %s1915_s24, %s2326_s24   ;;  %s1821_s23 = sphi %s1913_s23, %s2325_s23   ;;  %s1817_s22 = sphi %s1911_s22, %s2324_s22   ;;  %s1813_s21 = sphi %s1909_s21, %s2323_s21   ;;  %s1809_s20 = sphi %s1907_s20, %s2322_s20   ;;  %s1805_s19 = sphi %s1905_s19, %s2321_s19   ;;  %s1801_s18 = sphi %s1903_s18, %s2320_s18   ;;  %s1797_s17 = sphi %s1901_s17, %s2319_s17  }
   0xc   : > { %s1481_s28 = sadd.s32 4294967294, %s1833_s26   ;;  %s33_s29 = sadd.s32 1, %s1825_s24 }
   0xd   : > { %s36_s30 = sadd.s32 1, %s1829_s25  ;;  %p34_p0 = scmp.ge.s32.totalorder %s33_s29, 4 }
   0xe   : > { %s45_s12 = sadd.s32 1, %s1813_s21  ;;  %p52_p1 = scmp.ne.s32.totalorder %s1813_s21, %s1809_s20 }
   0xf   : > { %p53_p2 = scmp.eq.s32.totalorder %s1833_s26, 0  ;;  %s2329_s29 = smov (%p34_p0, %s33_s29), 0 }
  0x10   : > { %2303 = sst [smem:[#allocation10_spill]] %s2329_s29  ;;  %s2331_s30 = smov (!%p34_p0, %s36_s30), %s1829_s25 }
  0x11   : > { %s41_s13 = ssub.s32 %s1825_s24, %s2329_s29  ;;  %p1964_p3 = por %p53_p2, %p52_p1 }
  0x12   : > { %p38_p4 = scmp.ge.s32.totalorder %s2331_s30, 2  ;;  %s293_s15 = sadd.s32 1, %s1805_s19 }
  0x13   : > { %p303_p5 = scmp.ne.s32.totalorder %s1805_s19, %s1801_s18  ;;  %p304_p6 = scmp.eq.s32.totalorder %s1480_s27, 7 }
  0x14   : > { %s2333_s30 = smov (%p38_p4, %s2331_s30), 0  ;;  %p309_p8 = scmp.ne.s32.totalorder %s1801_s18, %s1797_s17 }
  0x15   : > { %2305 = sst [smem:[#allocation11_spill]] %s2333_s30  ;;  %p1973_p7 = por %p304_p6, %p303_p5 }
  0x16   : > { %s40_s11 = ssub.s32 %s1829_s25, %s2333_s30  ;;  %p310_p9 = scmp.eq.s32.totalorder %s1481_s28, 7 }
  0x17   : > { %s42_s29 = sor.u32 %s41_s13, %s40_s11  ;;  %p291_p10 = scmp.eq.s32.totalorder %s40_s11, 0 }
  0x18   : > { %p43_p11 = scmp.eq.s32.totalorder %s42_s29, 0  ;;  %p1981_p12 = por %p310_p9, %p309_p8 }
  0x19   : > { %s1986_s8 = scalar_select %p291_p10, %s1805_s19, %s293_s15  }
  0x1a   : > { %s2307_s10 = scalar_select %p1981_p12, 1, 0 }
  0x1b   : > { %s1989_s27 = scalar_select %p43_p11, %s1813_s21, %s45_s12  }
  0x1c   : > { %2308 = sst [smem:[#allocation12_spill]] %s2307_s10  ;;  %p1483_p13 = scmp.ge.s32.totalorder %s1833_s26, 8 }
  0x1d   : > { %2309 = sst [smem:[#allocation13_spill]] %s1989_s27 }
  0x1e   : > { %350 = sbr.rel (%p1483_p13) target bundleno = 68 (0x44), region = 48 }
  0x23   : > { %353 = sbr.rel (!%p1964_p3) target bundleno = 53 (0x35), region = 52  ;;  %s355_s28 = sand.u32 (%p1964_p3), 1, %s1813_s21  }
  0x24   : > { %s1486_s11 = sshll.u32 (%p1964_p3), %s1825_s24, 1  ;;  %s1484_s29 = sshll.u32 (%p1964_p3), %s355_s28, 6 }
  0x25   : > { %s1514_s13 = sshll.u32 (%p1964_p3), %s1829_s25, 6  ;;  %s2310_s0 = sld [smem:[#allocation14_spill]] (%p1964_p3) }
  0x26   : > { %s361_s30 = sadd.s32 (%p1964_p3), %s1514_s13, %s1486_s11  ;;  %s357_s27 = scalar_lea.vmem (%p1964_p3), [#allocation4], %s1484_s29 }
  0x27   : > { %s1488_s17 = sshll.u32 (%p1964_p3), %s361_s30, 2 }
  0x2b   : > { %s363_s12 = scalar_lea.vmem %s2310_s0, %s1488_s17 }
  0x2c   : > { %v380_v0 = vld [vmem:[%s363_s12] sm:$0xff]  }
  0x2d   : > { %v384_v1 = vld [vmem:[%s363_s12 + $0x20] sm:$0xff]   ;;  %381 = vst [vmem:[%s357_s27] sm:$0xff] %v380_v0  }
  0x2e   : > { %v388_v2 = vld [vmem:[%s363_s12 + $0x40] sm:$0xff]   ;;  %385 = vst [vmem:[%s357_s27 + $0x8] sm:$0xff] %v384_v1  }
  0x2f   : > { %389 = vst [vmem:[%s357_s27 + $0x10] sm:$0xff] %v388_v2   ;;  %v392_v3 = vld [vmem:[%s363_s12 + $0x60] sm:$0xff]  }
  0x30   : > { %v396_v4 = vld [vmem:[%s363_s12 + $0x80] sm:$0xff]   ;;  %393 = vst [vmem:[%s357_s27 + $0x18] sm:$0xff] %v392_v3  }
  0x31   : > { %v400_v5 = vld [vmem:[%s363_s12 + $0xa0] sm:$0xff]   ;;  %397 = vst [vmem:[%s357_s27 + $0x20] sm:$0xff] %v396_v4  }
  0x32   : > { %401 = vst [vmem:[%s357_s27 + $0x28] sm:$0xff] %v400_v5   ;;  %v404_v6 = vld [vmem:[%s363_s12 + $0xc0] sm:$0xff]  }
  0x33   : > { %v408_v7 = vld [vmem:[%s363_s12 + $0xe0] sm:$0xff]   ;;  %405 = vst [vmem:[%s357_s27 + $0x30] sm:$0xff] %v404_v6  }
  0x34   : > { %409 = vst [vmem:[%s357_s27 + $0x38] sm:$0xff] %v408_v7  }
  0x35 PF: > { %467 = sbr.rel (!%p1964_p3) target bundleno = 68 (0x44), region = 93  ;;  %s469_s10 = sand.u32 (%p1964_p3), 1, %s1813_s21  }
  0x36   : > { %s1491_s17 = sshll.u32 (%p1964_p3), %s1825_s24, 1  ;;  %s1489_s30 = sshll.u32 (%p1964_p3), %s469_s10, 7 }
  0x37   : > { %s1515_s28 = sshll.u32 (%p1964_p3), %s1829_s25, 6  ;;  %s471_s14 = scalar_lea.vmem (%p1964_p3), [#allocation5], %s1489_s30 }
  0x38   : > { %s475_s11 = sadd.s32 (%p1964_p3), %s1515_s28, %s1491_s17 }
  0x39   : > { %s1493_s29 = sshll.u32 (%p1964_p3), %s475_s11, 3 }
  0x3a   : > { %s2008_s0 = scalar_lea.vmem %s2282_s1, %s1493_s29 }
  0x3b   : > { %v536_v8 = vld [vmem:[%s2008_s0] sm:$0xff]  ;;  %v538_v9 = vld [vmem:[%s2008_s0 + $0x8] sm:$0xff] }
  0x3c   : > { %v540_v10 = vld [vmem:[%s2008_s0 + $0x40] sm:$0xff]  ;;  %537 = vst [vmem:[%s471_s14] sm:$0xff] %v536_v8  ;;  %539 = vst [vmem:[%s471_s14 + $0x8] sm:$0xff] %v538_v9  ;;  %v542_v11 = vld [vmem:[%s2008_s0 + $0x48] sm:$0xff] }
  0x3d   : > { %541 = vst [vmem:[%s471_s14 + $0x10] sm:$0xff] %v540_v10  ;;  %v544_v12 = vld [vmem:[%s2008_s0 + $0x80] sm:$0xff]  ;;  %v546_v13 = vld [vmem:[%s2008_s0 + $0x88] sm:$0xff]  ;;  %543 = vst [vmem:[%s471_s14 + $0x18] sm:$0xff] %v542_v11 }
  0x3e   : > { %545 = vst [vmem:[%s471_s14 + $0x20] sm:$0xff] %v544_v12  ;;  %547 = vst [vmem:[%s471_s14 + $0x28] sm:$0xff] %v546_v13  ;;  %v548_v14 = vld [vmem:[%s2008_s0 + $0xc0] sm:$0xff]  ;;  %v550_v15 = vld [vmem:[%s2008_s0 + $0xc8] sm:$0xff] }
  0x3f   : > { %v552_v16 = vld [vmem:[%s2008_s0 + $0x100] sm:$0xff]  ;;  %549 = vst [vmem:[%s471_s14 + $0x30] sm:$0xff] %v548_v14  ;;  %551 = vst [vmem:[%s471_s14 + $0x38] sm:$0xff] %v550_v15  ;;  %v554_v17 = vld [vmem:[%s2008_s0 + $0x108] sm:$0xff] }
  0x40   : > { %553 = vst [vmem:[%s471_s14 + $0x40] sm:$0xff] %v552_v16  ;;  %v556_v18 = vld [vmem:[%s2008_s0 + $0x140] sm:$0xff]  ;;  %v558_v19 = vld [vmem:[%s2008_s0 + $0x148] sm:$0xff]  ;;  %555 = vst [vmem:[%s471_s14 + $0x48] sm:$0xff] %v554_v17 }
  0x41   : > { %557 = vst [vmem:[%s471_s14 + $0x50] sm:$0xff] %v556_v18  ;;  %559 = vst [vmem:[%s471_s14 + $0x58] sm:$0xff] %v558_v19  ;;  %v560_v20 = vld [vmem:[%s2008_s0 + $0x180] sm:$0xff]  ;;  %v562_v21 = vld [vmem:[%s2008_s0 + $0x188] sm:$0xff] }
  0x42   : > { %v564_v22 = vld [vmem:[%s2008_s0 + $0x1c0] sm:$0xff]  ;;  %561 = vst [vmem:[%s471_s14 + $0x60] sm:$0xff] %v560_v20  ;;  %563 = vst [vmem:[%s471_s14 + $0x68] sm:$0xff] %v562_v21  ;;  %v566_v23 = vld [vmem:[%s2008_s0 + $0x1c8] sm:$0xff] }
  0x43   : > { %565 = vst [vmem:[%s471_s14 + $0x70] sm:$0xff] %v564_v22  ;;  %567 = vst [vmem:[%s471_s14 + $0x78] sm:$0xff] %v566_v23 }
  0x44 PF: > { %p1494_p0 = scmp.ge.s32.totalorder %s1833_s26, 1  ;;  %p579_p1 = scmp.lt.s32.totalorder %s1833_s26, 9 }
  0x46   : > { %p580_p2 = pnand %p1494_p0, %p579_p1 }
  0x47   : > { %s586_s27 = sand.u32 (!%p580_p2), 1, %s1809_s20   ;;  %s637_s12 = sand.u32 (!%p580_p2), 1, %s1801_s18  }
  0x48   : > { %583 = sbr.rel (%p580_p2) target bundleno = 1959 (0x7a7), region = 135  ;;  %s1495_s10 = sshll.u32 (!%p580_p2), %s586_s27, 6 }
  0x49   : > { %s1496_s17 = sshll.u32 (!%p580_p2), %s586_s27, 7  ;;  %s2032_s0 = sshll.u32 (!%p580_p2), %s637_s12, 3 }
  0x4a   : > { %p644_p3 = scmp.lt.s32.totalorder (!%p580_p2), %s1821_s23, 1  ;;  %s2041_s15 = scalar_lea.vmem (!%p580_p2), [#allocation4], %s1495_s10 }
  0x4b   : > { %s2043_s14 = scalar_lea.vmem (!%p580_p2), [#allocation5], %s1496_s17  ;;  %s639_s20 = scalar_lea.vmem (!%p580_p2), [#allocation6], %s2032_s0 }
  0x4c   : > { %p1499_p4 = scmp.ne.s32.totalorder (!%p580_p2), %s1817_s22, 0 }
  0x4d   : > { %s645_s30 = scalar_select %p644_p3, %s1821_s23, 1 }
  0x4e   : > { %651 = sbr.rel (%p1499_p4) target bundleno = 86 (0x56), region = 147 }
  0x4f   : > { %s1498_s28 = sshll.u32 %s645_s30, 3 }
  0x50   : > { %s2039_s13 = scalar_lea.vmem %s2283_s2, %s1498_s28 }
  0x53   : > { %vm652_vm0 = vcmask 261120   ;;  %vm654_vm1 = vcmask 7168   ;;  %v1835_v24 = vmov 0.0  }
  0x54   : > { %653 = vst.msk [vmem:[#allocation2] sm:$0xff] %vm652_vm0, %v1835_v24 }
  0x55   : > { %655 = vst.msk [vmem:[#allocation3] sm:$0xff] %vm654_vm1, %v1835_v24 }
  0x56 PF: > { %v690_v25 = vld [vmem:[%s2043_s14 + $0x10] sm:$0xff]  ;;  %vm916_vm2 = vcmask 7168   ;;  %v688_v26 = vld [vmem:[%s2043_s14] sm:$0xff]  ;;  %v691_v27 = vld [vmem:[%s2043_s14 + $0x18] sm:$0xff]  ;;  %v1836_v28 = vmov 0   ;;  %vm898_vm3 = vcmask 1041409  }
  0x57   : > { %1708 = vset.pattern.permute.xlu1 %v1836_v28  ;;  %1707 = vset.pattern.permute.xlu0 %v1836_v28  ;;  %v706_v29 = vcvt.s32.f32 %v690_v25  ;;  %v704_v30 = vcvt.s32.f32 %v688_v26  ;;  %v707_v31 = vcvt.s32.f32 %v691_v27  ;;  %v689_v32 = vld [vmem:[%s2043_s14 + $0x8] sm:$0xff]  ;;  %v692_v34 = vld [vmem:[%s2043_s14 + $0x20] sm:$0xff]  ;;  %v695_v38 = vld [vmem:[%s2043_s14 + $0x38] sm:$0xff]  ;;  %vm900_vm4 = vcmask 1042434   ;;  %p1500_p5 = scmp.ne.s32.totalorder %s1817_s22, 3 }
  0x58   : > { %v693_v33 = vld [vmem:[%s2043_s14 + $0x28] sm:$0xff]  ;;  %v705_v35 = vcvt.s32.f32 %v689_v32  ;;  %v708_v37 = vcvt.s32.f32 %v692_v34  ;;  %v694_v39 = vld [vmem:[%s2043_s14 + $0x30] sm:$0xff]  ;;  %v711_v43 = vcvt.s32.f32 %v695_v38  ;;  %v2062_v45 = vld [vmem:[%s2043_s14 + $0x40] sm:$0xff]  ;;  %vm902_vm5 = vcmask 1043459   ;;  %s2311_s27 = sld [smem:[#allocation15_spill]] (!%p1500_p5) }
  0x59   : > { %v709_v36 = vcvt.s32.f32 %v693_v33  ;;  %733 = vperm.xlu1 %1708, %v706_v29   ;;  %v926_v40 = vsel %vm916_vm2, %v706_v29, 0.0  ;;  %723 = vperm.xlu0 %1707, %v704_v30   ;;  %v917_v41 = vsel %vm916_vm2, %v704_v30, 0.0  ;;  %v927_v42 = vsel %vm916_vm2, %v707_v31, 0.0  ;;  %v2059_v44 = vld [vmem:[%s2043_s14 + $0x48] sm:$0xff]  ;;  %v2065_v46 = vld [vmem:[%s2043_s14 + $0x58] sm:$0xff]  ;;  %v2071_v51 = vld [vmem:[%s2043_s14 + $0x50] sm:$0xff] }
  0x5a   : > { %v928_v47 = vadd.f32 %v927_v42, %v926_v40  ;;  %v918_v48 = vsel %vm916_vm2, %v705_v35, 0.0  ;;  %v935_v50 = vsel %vm916_vm2, %v708_v37, 0.0  ;;  %v945_v54 = vsel %vm916_vm2, %v711_v43, 0.0  ;;  %v701_v4 = vld [vmem:[%s2043_s14 + $0x68] sm:$0xff]  ;;  %v700_v8 = vld [vmem:[%s2043_s14 + $0x60] sm:$0xff]  ;;  %v703_v20 = vld [vmem:[%s2043_s14 + $0x78] sm:$0xff] }
  0x5b   : > { %v936_v49 = vsel %vm916_vm2, %v709_v36, 0.0  ;;  %v919_v52 = vadd.f32 %v918_v48, %v917_v41  ;;  %v710_v55 = vcvt.s32.f32 %v694_v39  ;;  %v713_v57 = vcvt.s32.f32 %v2059_v44  ;;  %v702_v26 = vld [vmem:[%s2043_s14 + $0x70] sm:$0xff]  ;;  %s2312_s17 = sld [smem:[#allocation16_spill]] (!%p1500_p5) }
  0x5c   : > { %v937_v53 = vadd.f32 %v936_v49, %v935_v50  ;;  %v929_v56 = vrot.slane %v928_v47, 4  ;;  %v712_v58 = vcvt.s32.f32 %v2062_v45  ;;  %v715_v59 = vcvt.s32.f32 %v2065_v46 }
  0x5d   : > { %738 = vperm.xlu1 %1708, %v707_v31   ;;  %728 = vperm.xlu0 %1707, %v705_v35   ;;  %v920_v60 = vrot.slane %v919_v52, 4  ;;  %v944_v62 = vsel %vm916_vm2, %v710_v55, 0.0  ;;  %v714_v63 = vcvt.s32.f32 %v2071_v51  ;;  %v954_v2 = vsel %vm916_vm2, %v713_v57, 0.0 }
  0x5e   : > { %v938_v61 = vrot.slane %v937_v53, 4  ;;  %v930_v0 = vadd.f32 %v929_v56, %v928_v47  ;;  %v946_v1 = vadd.f32 %v945_v54, %v944_v62  ;;  %v953_v3 = vsel %vm916_vm2, %v712_v58, 0.0 }
  0x5f   : > { %v921_v5 = vadd.f32 %v920_v60, %v919_v52  ;;  %v955_v6 = vadd.f32 %v954_v2, %v953_v3  ;;  %v963_v7 = vsel %vm916_vm2, %v715_v59, 0.0  ;;  %v962_v11 = vsel %vm916_vm2, %v714_v63, 0.0 }
  0x60   : > { %v939_v9 = vadd.f32 %v938_v61, %v937_v53  ;;  %v947_v10 = vrot.slane %v946_v1, 4  ;;  %v931_v12 = vrot.slane %v930_v0, 2  ;;  %v964_v14 = vadd.f32 %v963_v7, %v962_v11  ;;  %v1548_v11 = vld [vmem:[%s2041_s15 + $0x8] sm:$0xff]  }
  0x61   : > { %v922_v13 = vrot.slane %v921_v5, 2  ;;  %748 = vperm.xlu1 %1708, %v709_v36   ;;  %743 = vperm.xlu0 %1707, %v708_v37   ;;  %v717_v15 = vcvt.s32.f32 %v701_v4  ;;  %v956_v16 = vrot.slane %v955_v6, 4  ;;  %v716_v17 = vcvt.s32.f32 %v700_v8  ;;  %v915_v8 = vld [vmem:[#allocation3] sm:$0xff] }
  0x62   : > { %v948_v18 = vadd.f32 %v947_v10, %v946_v1  ;;  %v940_v21 = vrot.slane %v939_v9, 2  ;;  %v932_v23 = vadd.f32 %v931_v12, %v930_v0  ;;  %v965_v25 = vrot.slane %v964_v14, 4 }
  0x63   : > { %v972_v19 = vsel %vm916_vm2, %v717_v15, 0.0  ;;  %v971_v22 = vsel %vm916_vm2, %v716_v17, 0.0  ;;  %v923_v24 = vadd.f32 %v922_v13, %v921_v5  ;;  %v957_v27 = vadd.f32 %v956_v16, %v955_v6 }
  0x64   : > { %v973_v28 = vadd.f32 %v972_v19, %v971_v22  ;;  %v719_v29 = vcvt.s32.f32 %v703_v20  ;;  %v949_v30 = vrot.slane %v948_v18, 2  ;;  %v941_v31 = vadd.f32 %v940_v21, %v939_v9 }
  0x65   : > { %758 = vperm.xlu1 %1708, %v711_v43   ;;  %753 = vperm.xlu0 %1707, %v710_v55   ;;  %v718_v34 = vcvt.s32.f32 %v702_v26  ;;  %v933_v35 = vrot.slane %v932_v23, 1  ;;  %v924_v36 = vrot.slane %v923_v24, 1  ;;  %v966_v37 = vadd.f32 %v965_v25, %v964_v14  ;;  %v1517_v14 = vld [vmem:[%s2041_s15] sm:$0xff]   ;;  %v1550_v26 = vld [vmem:[%s2041_s15 + $0x18] sm:$0xff]  }
  0x66   : > { %v974_v32 = vrot.slane %v973_v28, 4  ;;  %v981_v33 = vsel %vm916_vm2, %v719_v29, 0.0  ;;  %v958_v38 = vrot.slane %v957_v27, 2  ;;  %v950_v40 = vadd.f32 %v949_v30, %v948_v18  ;;  %v1549_v18 = vld [vmem:[%s2041_s15 + $0x10] sm:$0xff]  }
  0x67   : > { %v980_v39 = vsel %vm916_vm2, %v718_v34, 0.0  ;;  %v942_v42 = vrot.slane %v941_v31, 1  ;;  %v934_v44 = vadd.f32 %v933_v35, %v932_v23  ;;  %v925_v45 = vadd.f32 %v924_v36, %v923_v24 }
  0x68   : > { %v982_v41 = vadd.f32 %v981_v33, %v980_v39  ;;  %v975_v43 = vadd.f32 %v974_v32, %v973_v28  ;;  %v967_v46 = vrot.slane %v966_v37, 2  ;;  %v959_v48 = vadd.f32 %v958_v38, %v957_v27 }
  0x69   : > { %768 = vperm.xlu1 %1708, %v713_v57   ;;  %763 = vperm.xlu0 %1707, %v712_v58   ;;  %v951_v49 = vrot.slane %v950_v40, 1  ;;  %v943_v51 = vadd.f32 %v942_v42, %v941_v31  ;;  %v997_v53 = vsel %vm898_vm3, %v934_v44, %v925_v45  ;;  %vm904_vm6 = vcmask 1044484  }
  0x6a   : > { %v983_v47 = vrot.slane %v982_v41, 4  ;;  %v976_v52 = vrot.slane %v975_v43, 2  ;;  %v968_v54 = vadd.f32 %v967_v46, %v966_v37  ;;  %v960_v55 = vrot.slane %v959_v48, 1  ;;  %v1551_v37 = vld [vmem:[%s2041_s15 + $0x20] sm:$0xff]  }
  0x6b   : > { %v952_v56 = vadd.f32 %v951_v49, %v950_v40  ;;  %vm906_vm7 = vcmask 1045509   ;;  %vm908_vm8 = vcmask 1046534   ;;  %vm910_vm9 = vcmask 1047559  }
  0x6c   : > { %v984_v50 = vadd.f32 %v983_v47, %v982_v41  ;;  %v977_v58 = vadd.f32 %v976_v52, %v975_v43  ;;  %v969_v60 = vrot.slane %v968_v54, 1  ;;  %v961_v61 = vadd.f32 %v960_v55, %v959_v48 }
  0x6d   : > { %778 = vperm.xlu1 %1708, %v715_v59   ;;  %773 = vperm.xlu0 %1707, %v714_v63   ;;  %v998_v59 = vsel %vm900_vm4, %v943_v51, %v997_v53  ;;  %v1519_v16 = vunpack.c.h.bf16 %v1517_v14  ;;  %v1518_v19 = vunpack.c.l.bf16 %v1517_v14  ;;  %v1527_v24 = vunpack.c.h.bf16 %v1549_v18  ;;  %v1552_v51 = vld [vmem:[%s2041_s15 + $0x28] sm:$0xff]   ;;  %v1554_v14 = vld [vmem:[%s2041_s15 + $0x38] sm:$0xff]  }
  0x6e   : > { %v985_v57 = vrot.slane %v984_v50, 2  ;;  %v999_v63 = vsel %vm902_vm5, %v952_v56, %v998_v59  ;;  %v978_v0 = vrot.slane %v977_v58, 1  ;;  %v970_v1 = vadd.f32 %v969_v60, %v968_v54 }
  0x6f   : > { %v1000_v2 = vsel %vm904_vm6, %v961_v61, %v999_v63  ;;  %v1526_v25 = vunpack.c.l.bf16 %v1549_v18  ;;  %vm817_vm10 = vcmask 261120   ;;  %v1531_v32 = vunpack.c.h.bf16 %v1550_v26 }
  0x70   : > { %v986_v62 = vadd.f32 %v985_v57, %v984_v50  ;;  %v979_v4 = vadd.f32 %v978_v0, %v977_v58  ;;  %v1001_v5 = vsel %vm906_vm7, %v970_v1, %v1000_v2  ;;  %v1530_v36 = vunpack.c.l.bf16 %v1550_v26  ;;  %v1553_v0 = vld [vmem:[%s2041_s15 + $0x30] sm:$0xff]  }
  0x71   : > { %788 = vperm.xlu1 %1708, %v717_v15   ;;  %783 = vperm.xlu0 %1707, %v716_v17   ;;  %v1523_v15 = vunpack.c.h.bf16 %v1548_v11  ;;  %v1522_v17 = vunpack.c.l.bf16 %v1548_v11  ;;  %v1535_v46 = vunpack.c.h.bf16 %v1551_v37  ;;  %v1534_v50 = vunpack.c.l.bf16 %v1551_v37 }
  0x72   : > { %v987_v3 = vrot.slane %v986_v62, 1  ;;  %v1002_v7 = vsel %vm908_vm8, %v979_v4, %v1001_v5  ;;  %v1539_v59 = vunpack.c.h.bf16 %v1552_v51  ;;  %v1538_v63 = vunpack.c.l.bf16 %v1552_v51 }
  0x74   : > { %v988_v6 = vadd.f32 %v987_v3, %v986_v62 }
  0x75   : > { %798 = vperm.xlu1 %1708, %v719_v29   ;;  %793 = vperm.xlu0 %1707, %v718_v34  }
  0x76   : > { %v1003_v9 = vsel %vm910_vm9, %v988_v6, %v1002_v7 }
  0x77   : > { %v1005_v10 = vadd.f32 %v1003_v9, %v915_v8  ;;  %v1543_v8 = vunpack.c.h.bf16 %v1553_v0  ;;  %v1542_v9 = vunpack.c.l.bf16 %v1553_v0 }
  0x79   : > { %1006 = vst.msk [vmem:[#allocation3] sm:$0xff] %vm916_vm2, %v1005_v10 }
  0xd4   : > { %v734_v12 = vpop.permute.xlu1 %733  ;;  %v724_v13 = vpop.permute.xlu0 %723 }
  0xd5   : > { %v803_v27 = vmul.f32 %v1522_v17, %v734_v12  ;;  %v801_v28 = vmul.f32 %v1518_v19, %v724_v13 }
  0xd7   : > { %v827_v38 = vsel %vm817_vm10, %v803_v27, 0.0  ;;  %v818_v39 = vsel %vm817_vm10, %v801_v28, 0.0 }
  0xd8   : > { %v739_v20 = vpop.permute.xlu1 %738  ;;  %v729_v21 = vpop.permute.xlu0 %728 }
  0xd9   : > { %v804_v22 = vmul.f32 %v1523_v15, %v739_v20  ;;  %v802_v23 = vmul.f32 %v1519_v16, %v729_v21 }
  0xdb   : > { %v828_v29 = vsel %vm817_vm10, %v804_v22, 0.0  ;;  %v819_v33 = vsel %vm817_vm10, %v802_v23, 0.0 }
  0xdc   : > { %v749_v30 = vpop.permute.xlu1 %748  ;;  %v744_v31 = vpop.permute.xlu0 %743  ;;  %v829_v40 = vadd.f32 %v828_v29, %v827_v38  ;;  %v820_v43 = vadd.f32 %v819_v33, %v818_v39 }
  0xdd   : > { %v806_v34 = vmul.f32 %v1527_v24, %v749_v30  ;;  %v805_v35 = vmul.f32 %v1526_v25, %v744_v31  ;;  %v1547_v24 = vunpack.c.h.bf16 %v1554_v14  ;;  %v1546_v25 = vunpack.c.l.bf16 %v1554_v14 }
  0xde   : > { %v830_v52 = vrot.slane %v829_v40, 4  ;;  %v821_v55 = vrot.slane %v820_v43, 4 }
  0xdf   : > { %v837_v41 = vsel %vm817_vm10, %v806_v34, 0.0  ;;  %v836_v42 = vsel %vm817_vm10, %v805_v35, 0.0 }
  0xe0   : > { %v759_v44 = vpop.permute.xlu1 %758  ;;  %v754_v45 = vpop.permute.xlu0 %753  ;;  %v838_v47 = vadd.f32 %v837_v41, %v836_v42  ;;  %v831_v2 = vadd.f32 %v830_v52, %v829_v40  ;;  %v822_v5 = vadd.f32 %v821_v55, %v820_v43 }
  0xe1   : > { %v808_v48 = vmul.f32 %v1531_v32, %v759_v44  ;;  %v807_v49 = vmul.f32 %v1530_v36, %v754_v45 }
  0xe2   : > { %v839_v60 = vrot.slane %v838_v47, 4  ;;  %v832_v16 = vrot.slane %v831_v2, 2  ;;  %v823_v20 = vrot.slane %v822_v5, 2 }
  0xe3   : > { %v846_v53 = vsel %vm817_vm10, %v808_v48, 0.0  ;;  %v845_v54 = vsel %vm817_vm10, %v807_v49, 0.0 }
  0xe4   : > { %v847_v56 = vadd.f32 %v846_v53, %v845_v54  ;;  %v769_v57 = vpop.permute.xlu1 %768  ;;  %v764_v58 = vpop.permute.xlu0 %763  ;;  %v840_v10 = vadd.f32 %v839_v60, %v838_v47  ;;  %v833_v32 = vadd.f32 %v832_v16, %v831_v2  ;;  %v824_v36 = vadd.f32 %v823_v20, %v822_v5 }
  0xe5   : > { %v810_v61 = vmul.f32 %v1535_v46, %v769_v57  ;;  %v809_v62 = vmul.f32 %v1534_v50, %v764_v58 }
  0xe6   : > { %v848_v1 = vrot.slane %v847_v56, 4  ;;  %v841_v26 = vrot.slane %v840_v10, 2  ;;  %v834_v47 = vrot.slane %v833_v32, 1  ;;  %v825_v51 = vrot.slane %v824_v36, 1 }
  0xe7   : > { %v855_v3 = vsel %vm817_vm10, %v810_v61, 0.0  ;;  %v854_v4 = vsel %vm817_vm10, %v809_v62, 0.0 }
  0xe8   : > { %v779_v6 = vpop.permute.xlu1 %778  ;;  %v774_v7 = vpop.permute.xlu0 %773  ;;  %v856_v11 = vadd.f32 %v855_v3, %v854_v4  ;;  %v849_v15 = vadd.f32 %v848_v1, %v847_v56  ;;  %v842_v41 = vadd.f32 %v841_v26, %v840_v10  ;;  %v826_v61 = vadd.f32 %v825_v51, %v824_v36 }
  0xe9   : > { %v812_v12 = vmul.f32 %v1539_v59, %v779_v6  ;;  %v811_v13 = vmul.f32 %v1538_v63, %v774_v7  ;;  %v835_v59 = vadd.f32 %v834_v47, %v833_v32 }
  0xea   : > { %v857_v17 = vrot.slane %v856_v11, 4  ;;  %v850_v30 = vrot.slane %v849_v15, 2  ;;  %v843_v55 = vrot.slane %v842_v41, 1 }
  0xeb   : > { %v864_v18 = vsel %vm817_vm10, %v812_v12, 0.0  ;;  %v863_v19 = vsel %vm817_vm10, %v811_v13, 0.0  ;;  %v899_v6 = vsel %vm898_vm3, %v835_v59, %v826_v61 }
  0xec   : > { %v865_v21 = vadd.f32 %v864_v18, %v863_v19  ;;  %v789_v22 = vpop.permute.xlu1 %788  ;;  %v784_v23 = vpop.permute.xlu0 %783  ;;  %v858_v27 = vadd.f32 %v857_v17, %v856_v11  ;;  %v851_v44 = vadd.f32 %v850_v30, %v849_v15  ;;  %v844_v1 = vadd.f32 %v843_v55, %v842_v41  ;;  %v720_v15 = vld [vmem:[#allocation2] sm:$0xff] }
  0xed   : > { %v814_v28 = vmul.f32 %v1543_v8, %v789_v22  ;;  %v813_v29 = vmul.f32 %v1542_v9, %v784_v23 }
  0xee   : > { %v866_v31 = vrot.slane %v865_v21, 4  ;;  %v859_v33 = vrot.slane %v858_v27, 2  ;;  %v852_v56 = vrot.slane %v851_v44, 1  ;;  %v901_v9 = vsel %vm900_vm4, %v844_v1, %v899_v6 }
  0xef   : > { %v873_v34 = vsel %vm817_vm10, %v814_v28, 0.0  ;;  %v872_v35 = vsel %vm817_vm10, %v813_v29, 0.0 }
  0xf0   : > { %v867_v37 = vadd.f32 %v866_v31, %v865_v21  ;;  %v874_v38 = vadd.f32 %v873_v34, %v872_v35  ;;  %v799_v39 = vpop.permute.xlu1 %798  ;;  %v794_v40 = vpop.permute.xlu0 %793  ;;  %v860_v48 = vadd.f32 %v859_v33, %v858_v27  ;;  %v853_v2 = vadd.f32 %v852_v56, %v851_v44 }
  0xf1   : > { %v816_v42 = vmul.f32 %v1547_v24, %v799_v39  ;;  %v815_v43 = vmul.f32 %v1546_v25, %v794_v40 }
  0xf2   : > { %v868_v45 = vrot.slane %v867_v37, 2  ;;  %v875_v46 = vrot.slane %v874_v38, 4  ;;  %v861_v60 = vrot.slane %v860_v48, 1  ;;  %v903_v11 = vsel %vm902_vm5, %v853_v2, %v901_v9 }
  0xf3   : > { %v882_v49 = vsel %vm817_vm10, %v816_v42, 0.0  ;;  %v881_v50 = vsel %vm817_vm10, %v815_v43, 0.0 }
  0xf4   : > { %v869_v52 = vadd.f32 %v868_v45, %v867_v37  ;;  %v876_v53 = vadd.f32 %v875_v46, %v874_v38  ;;  %v883_v54 = vadd.f32 %v882_v49, %v881_v50  ;;  %v862_v5 = vadd.f32 %v861_v60, %v860_v48 }
  0xf6   : > { %v877_v57 = vrot.slane %v876_v53, 2  ;;  %v884_v58 = vrot.slane %v883_v54, 4  ;;  %v870_v62 = vrot.slane %v869_v52, 1  ;;  %v905_v13 = vsel %vm904_vm6, %v862_v5, %v903_v11 }
  0xf8   : > { %v878_v63 = vadd.f32 %v877_v57, %v876_v53  ;;  %v885_v0 = vadd.f32 %v884_v58, %v883_v54  ;;  %v871_v7 = vadd.f32 %v870_v62, %v869_v52 }
  0xfa   : > { %v879_v3 = vrot.slane %v878_v63, 1  ;;  %v886_v4 = vrot.slane %v885_v0, 2  ;;  %v907_v14 = vsel %vm906_vm7, %v871_v7, %v905_v13 }
  0xfc   : > { %v887_v8 = vadd.f32 %v886_v4, %v885_v0  ;;  %v880_v10 = vadd.f32 %v879_v3, %v878_v63 }
  0xfe   : > { %v888_v12 = vrot.slane %v887_v8, 1  ;;  %v909_v17 = vsel %vm908_vm8, %v880_v10, %v907_v14 }
 0x100   : > { %v889_v16 = vadd.f32 %v888_v12, %v887_v8 }
 0x101   : > { %1010 = sbr.rel (%p1500_p5) target bundleno = 1936 (0x790), region = 151 }
 0x102   : > { %v911_v18 = vsel %vm910_vm9, %v889_v16, %v909_v17 }
 0x103   : > { %v913_v19 = vadd.f32 %v911_v18, %v720_v15 }
 0x105   : > { %914 = vst.msk [vmem:[#allocation2] sm:$0xff] %vm817_vm10, %v913_v19 }
 0x106   : > { %v1011_v20 = vld [vmem:[#allocation3] sm:$0xff]  ;;  %v1837_v21 = vmov 0   ;;  %v1038_v29 = vld [vmem:[%s2284_s3 + $0x18] sm:$0xff]  ;;  %v1838_v30 = vmov 0.0   ;;  %v1037_v31 = vld [vmem:[%s2284_s3 + $0x10] sm:$0xff]  ;;  %vm1839_vm11 = vmmov 0   ;;  %v1324_v16 = vlaneseq }
 0x107   : > { %1709 = vset.pattern.permute.xlu0 %v1837_v21  ;;  %v1012_v22 = vmax.f32 %v1011_v20, 1e-09  ;;  %1710 = vset.pattern.permute.xlu1 %v1837_v21  ;;  %v1036_v32 = vld [vmem:[%s2284_s3 + $0x8] sm:$0xff]  ;;  %v1035_v33 = vld [vmem:[%s2284_s3] sm:$0xff]  ;;  %vm1120_vm14 = vcmask 523264   ;;  %v1158_v54 = vld [vmem:[%s2288_s7 + $0x38] sm:$0xff] }
 0x108   : > { %1574 = vmatprep.subr.mxu0 %v1838_v30  ;;  %1582 = vmatprep.mubr.msk.f32.mxu0 %vm1839_vm11, %v1838_v30  ;;  %v1501_v43 = vld [vmem:[%s2285_s4] ss:$0 sm:$0xff]  ;;  %v1157_v55 = vld [vmem:[%s2288_s7 + $0x30] sm:$0xff]  ;;  %v1156_v56 = vld [vmem:[%s2288_s7 + $0x28] sm:$0xff]  ;;  %v1325_v17 = vand.u32 127, %v1324_v16 }
 0x109   : > { %1711 = vrcp.f32 %v1012_v22  ;;  %1575 = vmatpush3.msra.mxu0 %v1038_v29  ;;  %1585 = vmatprep.subr.mxu1 %v1838_v30  ;;  %v1155_v57 = vld [vmem:[%s2288_s7 + $0x20] sm:$0xff]  ;;  %v1154_v58 = vld [vmem:[%s2288_s7 + $0x18] sm:$0xff]  ;;  %v1153_v59 = vld [vmem:[%s2288_s7 + $0x10] sm:$0xff] }
 0x10a   : > { %1576 = vmatprep.subr.mxu0 %v1838_v30  ;;  %1601 = vmatprep.mubr.msk.f32.mxu1 %vm1839_vm11, %v1838_v30  ;;  %v1152_v60 = vld [vmem:[%s2288_s7 + $0x8] sm:$0xff]  ;;  %v1151_v61 = vld [vmem:[%s2288_s7] sm:$0xff]  ;;  %v1243_v62 = vld [vmem:[%s2290_s9 + $0x18] sm:$0xff]  ;;  %vm1326_vm15 = vcmp.lt.s32.totalorder %v1325_v17, 8  ;;  %vm1351_vm1 = vcmp.eq.s32.totalorder %v1325_v17, 8 }
 0x10b   : > { %1577 = vmatpush3.msra.mxu0 %v1037_v31  ;;  %1586 = vmatpush3.msra.mxu1 %v1158_v54  ;;  %v1503_v3 = vld [vmem:[%s2286_s5] ss:$0 sm:$0xff]  ;;  %v1242_v8 = vld [vmem:[%s2290_s9 + $0x10] sm:$0xff]  ;;  %v1241_v9 = vld [vmem:[%s2290_s9 + $0x8] sm:$0xff] }
 0x10c   : > { %v1014_v24 = vld [vmem:[#allocation2] sm:$0xff]  ;;  %1578 = vmatprep.subr.mxu0 %v1838_v30  ;;  %1587 = vmatprep.subr.mxu1 %v1838_v30 }
 0x10d   : > { %1579 = vmatpush3.msra.mxu0 %v1036_v32  ;;  %1588 = vmatpush3.msra.mxu1 %v1157_v55  ;;  %v1504_v5 = vld [vmem:[%s2287_s6] ss:$0 sm:$0xff] }
 0x10e   : > { %1580 = vmatprep.subr.mxu0 %v1838_v30  ;;  %1589 = vmatprep.subr.mxu1 %v1838_v30  ;;  %v1240_v10 = vld [vmem:[%s2290_s9] sm:$0xff] }
 0x10f   : > { %1581 = vmatpush3.msra.mxu0 %v1035_v33  ;;  %1590 = vmatpush3.msra.mxu1 %v1156_v56  ;;  %v1505_v11 = vld [vmem:[%s2311_s27] ss:$0 sm:$0xff] }
 0x110   : > { %1604 = vmatprep.subr.mxu0 %v1838_v30  ;;  %1591 = vmatprep.subr.mxu1 %v1838_v30  ;;  %v1507_v18 = vld [vmem:[%s2312_s17] ss:$0 sm:$0xff] }
 0x111   : > { %1592 = vmatpush3.msra.mxu1 %v1155_v57 }
 0x112   : > { %1593 = vmatprep.subr.mxu1 %v1838_v30 }
 0x113   : > { %1594 = vmatpush3.msra.mxu1 %v1154_v58 }
 0x114   : > { %1595 = vmatprep.subr.mxu1 %v1838_v30 }
 0x115   : > { %1596 = vmatpush3.msra.mxu1 %v1153_v59 }
 0x116   : > { %v1712_v23 = vpop.eup %1711  ;;  %1597 = vmatprep.subr.mxu1 %v1838_v30 }
 0x117   : > { %1017 = vperm.xlu0 %1709, %v1712_v23   ;;  %1598 = vmatpush3.msra.mxu1 %v1152_v60 }
 0x118   : > { %1599 = vmatprep.subr.mxu1 %v1838_v30 }
 0x119   : > { %1600 = vmatpush3.msra.mxu1 %v1151_v61 }
 0x192   : > { %v1018_v25 = vpop.permute.xlu0 %1017 }
 0x193   : > { %v1020_v26 = vmul.f32 %v1018_v25, %v1014_v24 }
 0x195   : > { %v1021_v27 = vmul.f32 %v1020_v26, %v1020_v26 }
 0x197   : > { %v1022_v28 = vsel %vm817_vm10, %v1021_v27, 0.0  ;;  %v1340_v27 = vld [vmem:[%s2039_s13] sm:$0xff] }
 0x198   : > { %1023 = vadd.xlane.f32.xlu0 %v1022_v28 }
 0x221   : > { %v1024_v34 = vpop.xlane.xlu0 %1023 }
 0x222   : > { %1713 = vrsqrt.f32 %v1024_v34  ;;  %vm1027_vm12 = vcmp.eq.f32.partialorder %v1024_v34, inf  ;;  %v1030_v37 = vand.u32 2147483648, %v1024_v34  ;;  %vm1029_vm13 = vcmp.eq.f32.partialorder %v1024_v34, 0.0 }
 0x22f   : > { %v1714_v35 = vpop.eup %1713 }
 0x230   : > { %v1026_v36 = vmul.f32 %v1714_v35, %v1024_v34 }
 0x232   : > { %v1028_v38 = vsel %vm1027_vm12, %v1024_v34, %v1026_v36 }
 0x233   : > { %v1031_v39 = vsel %vm1029_vm13, %v1030_v37, %v1028_v38 }
 0x234   : > { %v1032_v40 = vmax.f32 %v1031_v39, 1e-12 }
 0x236   : > { %1715 = vrcp.f32 %v1032_v40 }
 0x243   : > { %v1716_v41 = vpop.eup %1715 }
 0x244   : > { %v1034_v42 = vmul.f32 %v1716_v41, %v1020_v26 }
 0x246   : > { %1583 = vmatmul.mubr.msk.f32.vlgmr.msra.gmra.mxu0 %vm817_vm10, %v1034_v42 }
 0x247   : > { %1612 = vmatprep.mubr.msk.f32.mxu0 %vm1839_vm11, %v1838_v30  ;;  %1605 = vmatpush3.msra.mxu0 %v1243_v62 }
 0x248   : > { %1606 = vmatprep.subr.mxu0 %v1838_v30 }
 0x249   : > { %1607 = vmatpush3.msra.mxu0 %v1242_v8 }
 0x24a   : > { %1608 = vmatprep.subr.mxu0 %v1838_v30 }
 0x24b   : > { %1609 = vmatpush3.msra.mxu0 %v1241_v9 }
 0x24c   : > { %1610 = vmatprep.subr.mxu0 %v1838_v30 }
 0x24d   : > { %1611 = vmatpush3.msra.mxu0 %v1240_v10 }
 0x306   : > { %v1115_v44 = vpop.f32.mrf.mxu0 }
 0x307   : > { %v1116_v45 = vadd.f32 %v1501_v43, %v1115_v44 }
 0x308   : > { %v1584_v46 = vpop.f32.mrf.mxu0 }
 0x309   : > { %v1119_v47 = vmax.f32 %v1116_v45, 0.0 }
 0x30b   : > { %v1121_v48 = vsel %vm1120_vm14, %v1119_v47, 0.0 }
 0x30c   : > { %1122 = vadd.xlane.f32.xlu1 %v1121_v48 }
 0x395   : > { %v1123_v49 = vpop.xlane.xlu1 %1122 }
 0x396   : > { %v1125_v50 = vmul.f32 0.015625, %v1123_v49 }
 0x398   : > { %v1126_v51 = vsub.f32 %v1119_v47, %v1125_v50 }
 0x39a   : > { %v1127_v52 = vmul.f32 %v1126_v51, %v1126_v51 }
 0x39c   : > { %v1128_v53 = vsel %vm1120_vm14, %v1127_v52, 0.0 }
 0x39d   : > { %1129 = vadd.xlane.f32.xlu1 %v1128_v53 }
 0x426   : > { %v1130_v63 = vpop.xlane.xlu1 %1129 }
 0x427   : > { %v1131_v0 = vmul.f32 0.015625, %v1130_v63 }
 0x429   : > { %v1132_v1 = vadd.f32 1e-05, %v1131_v0 }
 0x42b   : > { %1717 = vrsqrt.f32 %v1132_v1 }
 0x438   : > { %v1718_v2 = vpop.eup %1717 }
 0x439   : > { %v1134_v4 = vmul.f32 %v1718_v2, %v1126_v51 }
 0x43b   : > { %v1142_v6 = vmul.f32 %v1503_v3, %v1134_v4 }
 0x43d   : > { %v1150_v7 = vadd.f32 %v1504_v5, %v1142_v6 }
 0x43f   : > { %1602 = vmatmul.mubr.msk.f32.vlgmr.msra.gmra.mxu1 %vm1120_vm14, %v1150_v7 }
 0x4ff   : > { %v1235_v12 = vpop.f32.mrf.mxu1 }
 0x500   : > { %v1236_v13 = vadd.f32 %v1505_v11, %v1235_v12 }
 0x501   : > { %v1603_v14 = vpop.f32.mrf.mxu1 }
 0x502   : > { %v1239_v15 = vmax.f32 %v1236_v13, 0.0 }
 0x504   : > { %1613 = vmatmul.mubr.msk.f32.vlgmr.msra.gmra.mxu0 %vm817_vm10, %v1239_v15 }
 0x5c4   : > { %v1320_v19 = vpop.f32.mrf.mxu0 }
 0x5c5   : > { %v1321_v20 = vadd.f32 %v1507_v18, %v1320_v19 }
 0x5c6   : > { %v1614_v21 = vpop.f32.mrf.mxu0 }
 0x5c7   : > { %v1327_v22 = vsel %vm1326_vm15, %v1321_v20, -1e+30 }
 0x5c8   : > { %1328 = vmax.xlane.f32.xlu1 %v1327_v22 }
 0x651   : > { %v1329_v23 = vpop.xlane.xlu1 %1328 }
 0x652   : > { %v1330_v24 = vsub.f32 %v1327_v22, %v1329_v23 }
 0x654   : > { %v1331_v25 = vmul.f32 1.442695, %v1330_v24 }
 0x656   : > { %1719 = vpow2.f32 %v1331_v25 }
 0x663   : > { %v1720_v26 = vpop.eup %1719 }
 0x664   : > { %1333 = vadd.xlane.f32.xlu1 %v1720_v26 }
 0x675   : > { %1342 = vperm.xlu1 %1710, %v1340_v27  }
 0x6ed   : > { %v1334_v28 = vpop.xlane.xlu1 %1333 }
 0x6ee   : > { %1721 = vlog2.f32 %v1334_v28 }
 0x6ef   : > { %1723 = vrcp.f32 %v1334_v28 }
 0x6f1   : > { %v1343_v29 = vpop.permute.xlu1 %1342 }
 0x6f2   : > { %vm1344_vm0 = vcmp.eq.s32.totalorder %v1325_v17, %v1343_v29 }
 0x6f3   : > { %v1509_v33 = vsel %vm1344_vm0, 1.0, %v1838_v30 }
 0x6fb   : > { %v1722_v31 = vpop.eup %1721 }
 0x6fc   : > { %v1338_v32 = vmul.f32 0.6931472, %v1722_v31  ;;  %v1724_v36 = vpop.eup %1723 }
 0x6fd   : > { %v1336_v38 = vmul.f32 %v1724_v36, %v1720_v26 }
 0x6fe   : > { %v1339_v34 = vsub.f32 %v1330_v24, %v1338_v32 }
 0x700   : > { %v1347_v35 = vmul.f32 %v1509_v33, %v1339_v34 }
 0x702   : > { %1348 = vadd.xlane.f32.xlu1 %v1347_v35 }
 0x78b   : > { %v1349_v37 = vpop.xlane.xlu1 %1348 }
 0x78c   : > { %v1350_v39 = vsub.f32 0.0, %v1349_v37 }
 0x78e   : > { %v1352_v40 = vsel %vm1351_vm1, %v1350_v39, %v1336_v38 }
 0x78f   : > { %1353 = vst [vmem:[%s639_s20] sm:$0xff] %v1352_v40 }
 0x790 PF: > { %s1511_s13 = sshll.u32 %s1821_s23, 7  ;;  %s2313_s11 = sld [smem:[#allocation17_spill]] }
 0x791   : > { %s1368_s15 = sshll.u32 %s639_s20, 4  ;;  %s1355_s14 = scalar_lea.sflag [#allocation7], %s637_s12  ;;  %s1369_s15 = int_to_ptr.vmem [resolvable:$true] %s1368_s15 }
 0x792   : > { %s1725_s27 = scalar_lea.vmem %s1369_s15, 128  ;;  %s1840_s10 = smov [#allocation6]  }
 0x793   : > { %p1726_p6 = scmp.ne.s32.totalorder %s1369_s15, %s1725_s27  ;;  %s1729_s22 = sshll.u32 %s1840_s10, 4  ;;  %s1730_s22 = int_to_ptr.vmem [resolvable:$false] %s1729_s22 }
 0x794   : > { %s1731_s17 = scalar_lea.vmem %s1730_s22, 256  ;;  %p1732_p10 = scmp.lt.s32.totalorder %s1369_s15, %s1730_s22 }
 0x795   : > { %p1727_p8 = pnand %p1726_p6, %p1973_p7  ;;  %p1733_p11 = scmp.lt.s32.totalorder %s1731_s17, %s1725_s27 }
 0x796   : > { %s1366_s29 = scalar_lea.hbm %s2313_s11, %s1511_s13 }
 0x797   : > { %p1728_p9 = pneg %p1727_p8  ;;  %p1734_p13 = por %p1733_p11, %p1732_p10 }
 0x799   : > { %p1735_p0 = pnand %p1734_p13, %p1728_p9 }
 0x79b   : > { %1738 = shalt.err (!%p1735_p0)
}
 0x79c   : > { %s1739_s23 = scalar_lea.hbm %s1366_s29, 128  ;;  %s1743_s20 = scalar_lea.hbm %s2313_s11, 256 }
 0x79d   : > { %p1740_p1 = scmp.ne.s32.totalorder %s1366_s29, %s1739_s23  ;;  %p1744_p4 = scmp.lt.s32.totalorder %s1366_s29, %s2313_s11 }
 0x79e   : > { %p1745_p5 = scmp.lt.s32.totalorder %s1743_s20, %s1739_s23 }
 0x79f   : > { %p1741_p2 = pnand %p1740_p1, %p1973_p7 }
 0x7a0   : > { %p1746_p6 = por %p1745_p5, %p1744_p4 }
 0x7a1   : > { %p1742_p3 = pneg %p1741_p2 }
 0x7a3   : > { %p1747_p8 = pnand %p1746_p6, %p1742_p3 }
 0x7a5   : > { %1750 = shalt.err (!%p1747_p8)
}
 0x7a6   : > { %1615 = dma.vmem_to_hbm [thread:$0]  (%p1973_p7), %s1369_s15, 128, %s1366_s29, %s1355_s14  }
 0x7a7 PF: > { %s2314_s28 = sld [smem:[#allocation9_spill]]  ;;  %p1621_p9 = scmp.ge.s32.totalorder %s1833_s26, 2 }
 0x7a9   : > { %p1618_p10 = pnand %p1621_p9, %p1981_p12 }
 0x7ab   : > { %p1619_p11 = pneg %p1618_p10 }
 0x7ad   : > { %s1380_s10 = sand.u32 1, %s2314_s28  }
 0x7ae   : > { %s1381_s22 = scalar_lea.sflag [#allocation7], %s1380_s10 }
 0x7af   : > { %1792 = dma.done.wait (%p1619_p11), %s1381_s22, 128  }
 0x7b0   : > { %1794 = vsyncadd (%p1619_p11), %s1381_s22, 4294967168  ;;  %s24_s26 = sadd.s32 1, %s1833_s26   ;;  %s2316_s16 = sld [smem:[#allocation13_spill]] }
 0x7b1   : > { %p21_p13 = scmp.ge.s32.totalorder %s24_s26, 10   ;;  %s2317_s29 = sld [smem:[#allocation10_spill]] }
 0x7b2   : > { %s2318_s15 = sld [smem:[#allocation11_spill]]  ;;  %s2319_s17 = smov %s1801_s18 }
 0x7b3   : > { %s2320_s18 = smov %s1805_s19  ;;  %s2321_s19 = smov %s1986_s8 }
 0x7b4   : > { %s2322_s20 = smov %s1813_s21  ;;  %s2324_s22 = smov %s1825_s24 }
 0x7b5   : > { %s2325_s23 = smov %s1829_s25  ;;  %23 = sbr.rel (!%p21_p13) target bundleno = 11 (0xb), region = 202 }
 0x7b6   : > { %s2323_s21 = smov %s2316_s16 }
 0x7b7   : > { %s2326_s24 = smov %s2317_s29 }
 0x7b8   : > { %s2327_s25 = smov %s2318_s15 }
 0x7ba   :  { %1386 = vsyncpa [#allocation7], 1 }
 0x7bb   :  { %1388 = vsyncpa [#allocation7 + $0x1], 1 }

</bundles_post_ra>
